<compile_context>
chip_gen: v7x
topology: tpu7x:2x2x1
jax: 0.10.0
libtpu: 0.0.40
codegen_flags: <defaults>
</compile_context>

<pallas_src>
import jax
import jax.numpy as jnp
from jax import lax
from jax.experimental import pallas as pl
from jax.experimental.pallas import tpu as pltpu

LANE = 128


def _fused_gcn_kernel(x_ref, adj_ref, mask_ref, invc_ref, *rest):
    """Fused forward of all GCNBlocks (everything VMEM-resident).

    x_ref:    [BN, D0p]  node features, f32 (padding columns are zero)
    adj_ref:  [BN, BN]   block-diagonal adjacency with self loops, bf16
    mask_ref: [BN, 1]    node-validity mask, f32
    invc_ref: [1, 1]     1 / max(sum(mask), 1), f32 SMEM scalar
    rest:     per layer (W [Dinp, Doutp] bf16, packed [3, Doutp] f32 holding
              bias / BN-gamma / BN-beta rows), then the output ref [BN, Dlastp].
    """
    param_refs = rest[:-1]
    o_ref = rest[-1]
    num_layers = len(param_refs) // 2

    BN = x_ref.shape[0]
    adj_bf = adj_ref[...]                      # [BN, BN] bf16 (MXU operand)
    mask2 = mask_ref[...]                      # [BN, 1] f32
    inv_count = invc_ref[0, 0]                 # scalar

    # Hoisted mask lane-broadcasts: one per distinct feature width.
    widths = {x_ref.shape[1]} | {param_refs[2 * l].shape[1] for l in range(num_layers)}
    mask_b = {d: jnp.broadcast_to(mask2, (BN, d)) for d in sorted(widths)}

    # GCN_AutoEncoder: X = mask.unsqueeze(2) * X  (only before conv1).
    x2 = x_ref[...] * mask_b[x_ref.shape[1]]   # [BN, D0p] f32

    for l in range(num_layers):
        w = param_refs[2 * l][...]             # [Dinp, Doutp] bf16
        pv = param_refs[2 * l + 1][...]        # [3, Doutp] f32
        b, gamma, beta = pv[0:1, :], pv[1:2, :], pv[2:3, :]
        mb = mask_b[w.shape[1]]                # [BN, Doutp]

        # y = (adj + I) @ x : single 2-D MXU pass (self-loop folded into the
        # block-diagonal adjacency by the wrapper), bf16 in / f32 accumulate.
        y_agg = jnp.dot(adj_bf, x2.astype(jnp.bfloat16),
                        preferred_element_type=jnp.float32)       # [BN, Dinp]

        # y = y @ W + bias : single flattened 2-D MXU pass.
        y2 = jnp.dot(y_agg.astype(jnp.bfloat16), w,
                     preferred_element_type=jnp.float32) + b      # [BN, Doutp]

        # F.normalize(y, p=2, dim=2) == y * rsqrt(max(sum(y^2), 1e-24)).
        sumsq = jnp.sum(y2 * y2, axis=1, keepdims=True)
        y2 = y2 * lax.rsqrt(jnp.maximum(sumsq, 1e-24))

        # Masked BatchNorm1d, training-mode batch statistics (biased variance,
        # eps=1e-5) over the valid nodes of all graphs; invalid rows end up
        # exactly zero (matches the PyTorch gather/scatter for prefix masks).
        mean = jnp.sum(y2 * mb, axis=0, keepdims=True) * inv_count
        diff = (y2 - mean) * mb
        var = jnp.sum(diff * diff, axis=0, keepdims=True) * inv_count
        y2 = (y2 - mean) * lax.rsqrt(var + 1e-5)
        y2 = (y2 * gamma + beta) * mb

        # relu=0 and dropout=0.0 in GCN_AutoEncoder -> nothing more.
        x2 = y2

    o_ref[...] = x2.astype(o_ref.dtype)        # lane-dense [BN, Dlastp] store


def _pad_up(d, m=LANE):
    return ((d + m - 1) // m) * m


def gcn_autoencoder(node_feat, adj, mask, params, *, mxu_dtype=jnp.bfloat16):
    """Fused GCN_AutoEncoder forward.

    node_feat: [B, N, D0], adj: [B, N, N], mask: [B, N] (0/1, prefix-style).
    params: list of (W [Din, Dout], bias [Dout], gamma [Dout], beta [Dout]).
    """
    B, N, D0 = node_feat.shape
    BN = B * N
    f32 = jnp.float32

    douts = [p[0].shape[1] for p in params]
    d0p = _pad_up(D0)
    doutsp = [_pad_up(d) for d in douts]
    dinsp = [d0p] + doutsp[:-1]

    # Node features, flattened and zero-padded to a lane multiple.
    x = node_feat.astype(f32).reshape(BN, D0)
    if d0p != D0:
        x = jnp.pad(x, ((0, 0), (0, d0p - D0)))

    # Mask and 1/valid_count (clamped: guards the all-masked-out case where
    # PyTorch would NaN/error).
    mask2 = mask.astype(f32).reshape(BN, 1)
    inv_count = (1.0 / jnp.maximum(jnp.sum(mask2), 1.0)).reshape(1, 1).astype(f32)

    # Block-diagonal adjacency with the self loop (add_self) folded in, cast to
    # the MXU dtype: aggregation becomes one [BN,BN]@[BN,Din] dot per layer.
    adj_self = adj.astype(f32) + jnp.eye(N, dtype=f32)[None]           # [B,N,N]
    blk = jnp.eye(B, dtype=f32)
    adj_bd = (blk[:, None, :, None] * adj_self[:, :, None, :]).reshape(BN, BN)
    adj_bd = adj_bd.astype(mxu_dtype)

    # Per-layer params: padded weight (MXU dtype) + packed [bias; gamma; beta].
    flat_params = []
    for l, (w, b, g, be) in enumerate(params):
        din, dout = w.shape
        dinp, doutp = dinsp[l], doutsp[l]
        wp = jnp.zeros((dinp, doutp), f32).at[:din, :dout].set(w.astype(f32))
        pv = jnp.zeros((3, doutp), f32)
        pv = pv.at[0, :dout].set(b.astype(f32))
        pv = pv.at[1, :dout].set(g.astype(f32))
        pv = pv.at[2, :dout].set(be.astype(f32))
        flat_params += [wp.astype(mxu_dtype), pv]

    vmem = pl.BlockSpec(memory_space=pltpu.MemorySpace.VMEM)
    smem = pl.BlockSpec(memory_space=pltpu.MemorySpace.SMEM)

    out = pl.pallas_call(
        _fused_gcn_kernel,
        out_shape=jax.ShapeDtypeStruct((BN, doutsp[-1]), f32),
        in_specs=[vmem, vmem, vmem, smem] + [vmem] * len(flat_params),
        out_specs=vmem,
    )(x, adj_bd, mask2, inv_count, *flat_params)

    # Drop the zero-padded tail channels (lane-dense store inside the kernel,
    # cheap slice outside).
    return out.reshape(B, N, doutsp[-1])[..., :douts[-1]]


def init_params(key, dims):
    """Per-block params: (W xavier_normal, bias zeros, BN gamma ones, BN beta zeros)."""
    params = []
    for din, dout in zip(dims[:-1], dims[1:]):
        key, sub = jax.random.split(key)
        std = (2.0 / (din + dout)) ** 0.5
        w = std * jax.random.normal(sub, (din, dout), dtype=jnp.float32)
        b = jnp.zeros((dout,), jnp.float32)
        gamma = jnp.ones((dout,), jnp.float32)
        beta = jnp.zeros((dout,), jnp.float32)
        params.append((w, b, gamma, beta))
    return params


if __name__ == "__main__":
    # Small shapes consistent with the module (input_dim scaled down to 64).
    B, N, D = 2, 8, 64
    dims = [D, 256, 64, 256, D]   # conv1..conv4 feature sizes

    key = jax.random.PRNGKey(0)
    k_feat, k_adj, k_par = jax.random.split(key, 3)

    node_feat = jax.random.normal(k_feat, (B, N, D), dtype=jnp.float32)
    a = jax.random.uniform(k_adj, (B, N, N), dtype=jnp.float32)
    adj = 0.5 * (a + jnp.swapaxes(a, 1, 2))   # symmetric dense adjacency
    # Prefix-style node mask (valid nodes come first), as assumed by the BN path.
    mask = jnp.array([[1, 1, 1, 1, 1, 1, 0, 0],
                      [1, 1, 1, 1, 1, 1, 1, 1]], dtype=jnp.float32)

    params = init_params(k_par, dims)

    out = gcn_autoencoder(node_feat, adj, mask, params)
    out = jax.block_until_ready(out)
    assert out.shape == (B, N, D) and out.dtype == jnp.float32
    assert bool(jnp.all(jnp.isfinite(out)))
    print("KERNEL_OK")
</pallas_src>

<mosaic_0001>
module attributes {stable_mosaic.version = 11 : i64} {
  func.func @_fused_gcn_kernel(%arg0: memref<16x128xf32, #tpu.memory_space<vmem>>, %arg1: memref<16x16xbf16, #tpu.memory_space<vmem>>, %arg2: memref<16x1xf32, #tpu.memory_space<vmem>>, %arg3: memref<1x1xf32, #tpu.memory_space<smem>>, %arg4: memref<128x256xbf16, #tpu.memory_space<vmem>>, %arg5: memref<3x256xf32, #tpu.memory_space<vmem>>, %arg6: memref<256x128xbf16, #tpu.memory_space<vmem>>, %arg7: memref<3x128xf32, #tpu.memory_space<vmem>>, %arg8: memref<128x256xbf16, #tpu.memory_space<vmem>>, %arg9: memref<3x256xf32, #tpu.memory_space<vmem>>, %arg10: memref<256x128xbf16, #tpu.memory_space<vmem>>, %arg11: memref<3x128xf32, #tpu.memory_space<vmem>>, %arg12: memref<16x128xf32, #tpu.memory_space<vmem>>) attributes {dimension_semantics = [], scalar_prefetch = 0 : i64, scratch_operands = 0 : i64, tpu.core_type = #tpu.core_type<tc>} {
    %c0 = arith.constant 0 : index
    %c0_0 = arith.constant 0 : index
    %0 = vector.load %arg1[%c0, %c0_0] : memref<16x16xbf16, #tpu.memory_space<vmem>>, vector<16x16xbf16>
    %c0_1 = arith.constant 0 : index
    %c0_2 = arith.constant 0 : index
    %1 = vector.load %arg2[%c0_1, %c0_2] : memref<16x1xf32, #tpu.memory_space<vmem>>, vector<16x1xf32>
    %c0_3 = arith.constant 0 : index
    %c0_4 = arith.constant 0 : index
    %2 = memref.load %arg3[%c0_3, %c0_4] : memref<1x1xf32, #tpu.memory_space<smem>>
    %3 = vector.shape_cast %1 : vector<16x1xf32> to vector<16x1xf32>
    %4 = vector.broadcast %3 : vector<16x1xf32> to vector<16x128xf32>
    %5 = vector.shape_cast %1 : vector<16x1xf32> to vector<16x1xf32>
    %6 = vector.broadcast %5 : vector<16x1xf32> to vector<16x256xf32>
    %c0_5 = arith.constant 0 : index
    %c0_6 = arith.constant 0 : index
    %7 = vector.load %arg0[%c0_5, %c0_6] : memref<16x128xf32, #tpu.memory_space<vmem>>, vector<16x128xf32>
    %8 = arith.mulf %7, %4 : vector<16x128xf32>
    %c0_7 = arith.constant 0 : index
    %c0_8 = arith.constant 0 : index
    %9 = vector.load %arg4[%c0_7, %c0_8] : memref<128x256xbf16, #tpu.memory_space<vmem>>, vector<128x256xbf16>
    %c0_9 = arith.constant 0 : index
    %c0_10 = arith.constant 0 : index
    %10 = vector.load %arg5[%c0_9, %c0_10] : memref<3x256xf32, #tpu.memory_space<vmem>>, vector<3x256xf32>
    %11 = vector.extract_strided_slice %10 {offsets = [0, 0], sizes = [1, 256], strides = [1, 1]} : vector<3x256xf32> to vector<1x256xf32>
    %12 = vector.extract_strided_slice %10 {offsets = [1, 0], sizes = [1, 256], strides = [1, 1]} : vector<3x256xf32> to vector<1x256xf32>
    %13 = vector.extract_strided_slice %10 {offsets = [2, 0], sizes = [1, 256], strides = [1, 1]} : vector<3x256xf32> to vector<1x256xf32>
    %14 = arith.truncf %8 : vector<16x128xf32> to vector<16x128xbf16>
    %cst = arith.constant dense<0.000000e+00> : vector<16x128xf32>
    %15 = tpu.matmul %0, %14, %cst {dimension_numbers = #tpu.dot_dimension_numbers<[1], [0], [0], [1], [0, 0, 1, 1], [], []>} : vector<16x16xbf16>, vector<16x128xbf16>, vector<16x128xf32> -> vector<16x128xf32>
    %16 = arith.truncf %15 : vector<16x128xf32> to vector<16x128xbf16>
    %cst_11 = arith.constant dense<0.000000e+00> : vector<16x256xf32>
    %17 = tpu.matmul %16, %9, %cst_11 {dimension_numbers = #tpu.dot_dimension_numbers<[1], [0], [0], [1], [0, 0, 1, 1], [], []>} : vector<16x128xbf16>, vector<128x256xbf16>, vector<16x256xf32> -> vector<16x256xf32>
    %18 = vector.broadcast %11 : vector<1x256xf32> to vector<16x256xf32>
    %19 = arith.addf %17, %18 : vector<16x256xf32>
    %20 = arith.mulf %19, %19 : vector<16x256xf32>
    %cst_12 = arith.constant dense<0.000000e+00> : vector<16xf32>
    %21 = vector.multi_reduction <add>, %20, %cst_12 [1] : vector<16x256xf32> to vector<16xf32>
    %22 = vector.shape_cast %21 : vector<16xf32> to vector<16x1xf32>
    %cst_13 = arith.constant 1.000000e-24 : f32
    %23 = vector.broadcast %cst_13 : f32 to vector<16x1xf32>
    %24 = arith.maximumf %22, %23 : vector<16x1xf32>
    %25 = math.rsqrt %24 : vector<16x1xf32>
    %26 = vector.broadcast %25 : vector<16x1xf32> to vector<16x256xf32>
    %27 = arith.mulf %19, %26 : vector<16x256xf32>
    %28 = arith.mulf %27, %6 : vector<16x256xf32>
    %cst_14 = arith.constant dense<0.000000e+00> : vector<256xf32>
    %29 = vector.multi_reduction <add>, %28, %cst_14 [0] : vector<16x256xf32> to vector<256xf32>
    %30 = vector.shape_cast %29 : vector<256xf32> to vector<1x256xf32>
    %31 = vector.broadcast %2 : f32 to vector<1x256xf32>
    %32 = arith.mulf %30, %31 : vector<1x256xf32>
    %33 = vector.broadcast %32 : vector<1x256xf32> to vector<16x256xf32>
    %34 = arith.subf %27, %33 : vector<16x256xf32>
    %35 = arith.mulf %34, %6 : vector<16x256xf32>
    %36 = arith.mulf %35, %35 : vector<16x256xf32>
    %cst_15 = arith.constant dense<0.000000e+00> : vector<256xf32>
    %37 = vector.multi_reduction <add>, %36, %cst_15 [0] : vector<16x256xf32> to vector<256xf32>
    %38 = vector.shape_cast %37 : vector<256xf32> to vector<1x256xf32>
    %39 = vector.broadcast %2 : f32 to vector<1x256xf32>
    %40 = arith.mulf %38, %39 : vector<1x256xf32>
    %41 = vector.broadcast %32 : vector<1x256xf32> to vector<16x256xf32>
    %42 = arith.subf %27, %41 : vector<16x256xf32>
    %cst_16 = arith.constant 9.99999974E-6 : f32
    %43 = vector.broadcast %cst_16 : f32 to vector<1x256xf32>
    %44 = arith.addf %40, %43 : vector<1x256xf32>
    %45 = math.rsqrt %44 : vector<1x256xf32>
    %46 = vector.broadcast %45 : vector<1x256xf32> to vector<16x256xf32>
    %47 = arith.mulf %42, %46 : vector<16x256xf32>
    %48 = vector.broadcast %12 : vector<1x256xf32> to vector<16x256xf32>
    %49 = arith.mulf %47, %48 : vector<16x256xf32>
    %50 = vector.broadcast %13 : vector<1x256xf32> to vector<16x256xf32>
    %51 = arith.addf %49, %50 : vector<16x256xf32>
    %52 = arith.mulf %51, %6 : vector<16x256xf32>
    %c0_17 = arith.constant 0 : index
    %c0_18 = arith.constant 0 : index
    %53 = vector.load %arg6[%c0_17, %c0_18] : memref<256x128xbf16, #tpu.memory_space<vmem>>, vector<256x128xbf16>
    %c0_19 = arith.constant 0 : index
    %c0_20 = arith.constant 0 : index
    %54 = vector.load %arg7[%c0_19, %c0_20] : memref<3x128xf32, #tpu.memory_space<vmem>>, vector<3x128xf32>
    %55 = vector.extract_strided_slice %54 {offsets = [0, 0], sizes = [1, 128], strides = [1, 1]} : vector<3x128xf32> to vector<1x128xf32>
    %56 = vector.extract_strided_slice %54 {offsets = [1, 0], sizes = [1, 128], strides = [1, 1]} : vector<3x128xf32> to vector<1x128xf32>
    %57 = vector.extract_strided_slice %54 {offsets = [2, 0], sizes = [1, 128], strides = [1, 1]} : vector<3x128xf32> to vector<1x128xf32>
    %58 = arith.truncf %52 : vector<16x256xf32> to vector<16x256xbf16>
    %cst_21 = arith.constant dense<0.000000e+00> : vector<16x256xf32>
    %59 = tpu.matmul %0, %58, %cst_21 {dimension_numbers = #tpu.dot_dimension_numbers<[1], [0], [0], [1], [0, 0, 1, 1], [], []>} : vector<16x16xbf16>, vector<16x256xbf16>, vector<16x256xf32> -> vector<16x256xf32>
    %60 = arith.truncf %59 : vector<16x256xf32> to vector<16x256xbf16>
    %cst_22 = arith.constant dense<0.000000e+00> : vector<16x128xf32>
    %61 = tpu.matmul %60, %53, %cst_22 {dimension_numbers = #tpu.dot_dimension_numbers<[1], [0], [0], [1], [0, 0, 1, 1], [], []>} : vector<16x256xbf16>, vector<256x128xbf16>, vector<16x128xf32> -> vector<16x128xf32>
    %62 = vector.broadcast %55 : vector<1x128xf32> to vector<16x128xf32>
    %63 = arith.addf %61, %62 : vector<16x128xf32>
    %64 = arith.mulf %63, %63 : vector<16x128xf32>
    %cst_23 = arith.constant dense<0.000000e+00> : vector<16xf32>
    %65 = vector.multi_reduction <add>, %64, %cst_23 [1] : vector<16x128xf32> to vector<16xf32>
    %66 = vector.shape_cast %65 : vector<16xf32> to vector<16x1xf32>
    %cst_24 = arith.constant 1.000000e-24 : f32
    %67 = vector.broadcast %cst_24 : f32 to vector<16x1xf32>
    %68 = arith.maximumf %66, %67 : vector<16x1xf32>
    %69 = math.rsqrt %68 : vector<16x1xf32>
    %70 = vector.broadcast %69 : vector<16x1xf32> to vector<16x128xf32>
    %71 = arith.mulf %63, %70 : vector<16x128xf32>
    %72 = arith.mulf %71, %4 : vector<16x128xf32>
    %cst_25 = arith.constant dense<0.000000e+00> : vector<128xf32>
    %73 = vector.multi_reduction <add>, %72, %cst_25 [0] : vector<16x128xf32> to vector<128xf32>
    %74 = vector.shape_cast %73 : vector<128xf32> to vector<1x128xf32>
    %75 = vector.broadcast %2 : f32 to vector<1x128xf32>
    %76 = arith.mulf %74, %75 : vector<1x128xf32>
    %77 = vector.broadcast %76 : vector<1x128xf32> to vector<16x128xf32>
    %78 = arith.subf %71, %77 : vector<16x128xf32>
    %79 = arith.mulf %78, %4 : vector<16x128xf32>
    %80 = arith.mulf %79, %79 : vector<16x128xf32>
    %cst_26 = arith.constant dense<0.000000e+00> : vector<128xf32>
    %81 = vector.multi_reduction <add>, %80, %cst_26 [0] : vector<16x128xf32> to vector<128xf32>
    %82 = vector.shape_cast %81 : vector<128xf32> to vector<1x128xf32>
    %83 = vector.broadcast %2 : f32 to vector<1x128xf32>
    %84 = arith.mulf %82, %83 : vector<1x128xf32>
    %85 = vector.broadcast %76 : vector<1x128xf32> to vector<16x128xf32>
    %86 = arith.subf %71, %85 : vector<16x128xf32>
    %cst_27 = arith.constant 9.99999974E-6 : f32
    %87 = vector.broadcast %cst_27 : f32 to vector<1x128xf32>
    %88 = arith.addf %84, %87 : vector<1x128xf32>
    %89 = math.rsqrt %88 : vector<1x128xf32>
    %90 = vector.broadcast %89 : vector<1x128xf32> to vector<16x128xf32>
    %91 = arith.mulf %86, %90 : vector<16x128xf32>
    %92 = vector.broadcast %56 : vector<1x128xf32> to vector<16x128xf32>
    %93 = arith.mulf %91, %92 : vector<16x128xf32>
    %94 = vector.broadcast %57 : vector<1x128xf32> to vector<16x128xf32>
    %95 = arith.addf %93, %94 : vector<16x128xf32>
    %96 = arith.mulf %95, %4 : vector<16x128xf32>
    %c0_28 = arith.constant 0 : index
    %c0_29 = arith.constant 0 : index
    %97 = vector.load %arg8[%c0_28, %c0_29] : memref<128x256xbf16, #tpu.memory_space<vmem>>, vector<128x256xbf16>
    %c0_30 = arith.constant 0 : index
    %c0_31 = arith.constant 0 : index
    %98 = vector.load %arg9[%c0_30, %c0_31] : memref<3x256xf32, #tpu.memory_space<vmem>>, vector<3x256xf32>
    %99 = vector.extract_strided_slice %98 {offsets = [0, 0], sizes = [1, 256], strides = [1, 1]} : vector<3x256xf32> to vector<1x256xf32>
    %100 = vector.extract_strided_slice %98 {offsets = [1, 0], sizes = [1, 256], strides = [1, 1]} : vector<3x256xf32> to vector<1x256xf32>
    %101 = vector.extract_strided_slice %98 {offsets = [2, 0], sizes = [1, 256], strides = [1, 1]} : vector<3x256xf32> to vector<1x256xf32>
    %102 = arith.truncf %96 : vector<16x128xf32> to vector<16x128xbf16>
    %cst_32 = arith.constant dense<0.000000e+00> : vector<16x128xf32>
    %103 = tpu.matmul %0, %102, %cst_32 {dimension_numbers = #tpu.dot_dimension_numbers<[1], [0], [0], [1], [0, 0, 1, 1], [], []>} : vector<16x16xbf16>, vector<16x128xbf16>, vector<16x128xf32> -> vector<16x128xf32>
    %104 = arith.truncf %103 : vector<16x128xf32> to vector<16x128xbf16>
    %cst_33 = arith.constant dense<0.000000e+00> : vector<16x256xf32>
    %105 = tpu.matmul %104, %97, %cst_33 {dimension_numbers = #tpu.dot_dimension_numbers<[1], [0], [0], [1], [0, 0, 1, 1], [], []>} : vector<16x128xbf16>, vector<128x256xbf16>, vector<16x256xf32> -> vector<16x256xf32>
    %106 = vector.broadcast %99 : vector<1x256xf32> to vector<16x256xf32>
    %107 = arith.addf %105, %106 : vector<16x256xf32>
    %108 = arith.mulf %107, %107 : vector<16x256xf32>
    %cst_34 = arith.constant dense<0.000000e+00> : vector<16xf32>
    %109 = vector.multi_reduction <add>, %108, %cst_34 [1] : vector<16x256xf32> to vector<16xf32>
    %110 = vector.shape_cast %109 : vector<16xf32> to vector<16x1xf32>
    %cst_35 = arith.constant 1.000000e-24 : f32
    %111 = vector.broadcast %cst_35 : f32 to vector<16x1xf32>
    %112 = arith.maximumf %110, %111 : vector<16x1xf32>
    %113 = math.rsqrt %112 : vector<16x1xf32>
    %114 = vector.broadcast %113 : vector<16x1xf32> to vector<16x256xf32>
    %115 = arith.mulf %107, %114 : vector<16x256xf32>
    %116 = arith.mulf %115, %6 : vector<16x256xf32>
    %cst_36 = arith.constant dense<0.000000e+00> : vector<256xf32>
    %117 = vector.multi_reduction <add>, %116, %cst_36 [0] : vector<16x256xf32> to vector<256xf32>
    %118 = vector.shape_cast %117 : vector<256xf32> to vector<1x256xf32>
    %119 = vector.broadcast %2 : f32 to vector<1x256xf32>
    %120 = arith.mulf %118, %119 : vector<1x256xf32>
    %121 = vector.broadcast %120 : vector<1x256xf32> to vector<16x256xf32>
    %122 = arith.subf %115, %121 : vector<16x256xf32>
    %123 = arith.mulf %122, %6 : vector<16x256xf32>
    %124 = arith.mulf %123, %123 : vector<16x256xf32>
    %cst_37 = arith.constant dense<0.000000e+00> : vector<256xf32>
    %125 = vector.multi_reduction <add>, %124, %cst_37 [0] : vector<16x256xf32> to vector<256xf32>
    %126 = vector.shape_cast %125 : vector<256xf32> to vector<1x256xf32>
    %127 = vector.broadcast %2 : f32 to vector<1x256xf32>
    %128 = arith.mulf %126, %127 : vector<1x256xf32>
    %129 = vector.broadcast %120 : vector<1x256xf32> to vector<16x256xf32>
    %130 = arith.subf %115, %129 : vector<16x256xf32>
    %cst_38 = arith.constant 9.99999974E-6 : f32
    %131 = vector.broadcast %cst_38 : f32 to vector<1x256xf32>
    %132 = arith.addf %128, %131 : vector<1x256xf32>
    %133 = math.rsqrt %132 : vector<1x256xf32>
    %134 = vector.broadcast %133 : vector<1x256xf32> to vector<16x256xf32>
    %135 = arith.mulf %130, %134 : vector<16x256xf32>
    %136 = vector.broadcast %100 : vector<1x256xf32> to vector<16x256xf32>
    %137 = arith.mulf %135, %136 : vector<16x256xf32>
    %138 = vector.broadcast %101 : vector<1x256xf32> to vector<16x256xf32>
    %139 = arith.addf %137, %138 : vector<16x256xf32>
    %140 = arith.mulf %139, %6 : vector<16x256xf32>
    %c0_39 = arith.constant 0 : index
    %c0_40 = arith.constant 0 : index
    %141 = vector.load %arg10[%c0_39, %c0_40] : memref<256x128xbf16, #tpu.memory_space<vmem>>, vector<256x128xbf16>
    %c0_41 = arith.constant 0 : index
    %c0_42 = arith.constant 0 : index
    %142 = vector.load %arg11[%c0_41, %c0_42] : memref<3x128xf32, #tpu.memory_space<vmem>>, vector<3x128xf32>
    %143 = vector.extract_strided_slice %142 {offsets = [0, 0], sizes = [1, 128], strides = [1, 1]} : vector<3x128xf32> to vector<1x128xf32>
    %144 = vector.extract_strided_slice %142 {offsets = [1, 0], sizes = [1, 128], strides = [1, 1]} : vector<3x128xf32> to vector<1x128xf32>
    %145 = vector.extract_strided_slice %142 {offsets = [2, 0], sizes = [1, 128], strides = [1, 1]} : vector<3x128xf32> to vector<1x128xf32>
    %146 = arith.truncf %140 : vector<16x256xf32> to vector<16x256xbf16>
    %cst_43 = arith.constant dense<0.000000e+00> : vector<16x256xf32>
    %147 = tpu.matmul %0, %146, %cst_43 {dimension_numbers = #tpu.dot_dimension_numbers<[1], [0], [0], [1], [0, 0, 1, 1], [], []>} : vector<16x16xbf16>, vector<16x256xbf16>, vector<16x256xf32> -> vector<16x256xf32>
    %148 = arith.truncf %147 : vector<16x256xf32> to vector<16x256xbf16>
    %cst_44 = arith.constant dense<0.000000e+00> : vector<16x128xf32>
    %149 = tpu.matmul %148, %141, %cst_44 {dimension_numbers = #tpu.dot_dimension_numbers<[1], [0], [0], [1], [0, 0, 1, 1], [], []>} : vector<16x256xbf16>, vector<256x128xbf16>, vector<16x128xf32> -> vector<16x128xf32>
    %150 = vector.broadcast %143 : vector<1x128xf32> to vector<16x128xf32>
    %151 = arith.addf %149, %150 : vector<16x128xf32>
    %152 = arith.mulf %151, %151 : vector<16x128xf32>
    %cst_45 = arith.constant dense<0.000000e+00> : vector<16xf32>
    %153 = vector.multi_reduction <add>, %152, %cst_45 [1] : vector<16x128xf32> to vector<16xf32>
    %154 = vector.shape_cast %153 : vector<16xf32> to vector<16x1xf32>
    %cst_46 = arith.constant 1.000000e-24 : f32
    %155 = vector.broadcast %cst_46 : f32 to vector<16x1xf32>
    %156 = arith.maximumf %154, %155 : vector<16x1xf32>
    %157 = math.rsqrt %156 : vector<16x1xf32>
    %158 = vector.broadcast %157 : vector<16x1xf32> to vector<16x128xf32>
    %159 = arith.mulf %151, %158 : vector<16x128xf32>
    %160 = arith.mulf %159, %4 : vector<16x128xf32>
    %cst_47 = arith.constant dense<0.000000e+00> : vector<128xf32>
    %161 = vector.multi_reduction <add>, %160, %cst_47 [0] : vector<16x128xf32> to vector<128xf32>
    %162 = vector.shape_cast %161 : vector<128xf32> to vector<1x128xf32>
    %163 = vector.broadcast %2 : f32 to vector<1x128xf32>
    %164 = arith.mulf %162, %163 : vector<1x128xf32>
    %165 = vector.broadcast %164 : vector<1x128xf32> to vector<16x128xf32>
    %166 = arith.subf %159, %165 : vector<16x128xf32>
    %167 = arith.mulf %166, %4 : vector<16x128xf32>
    %168 = arith.mulf %167, %167 : vector<16x128xf32>
    %cst_48 = arith.constant dense<0.000000e+00> : vector<128xf32>
    %169 = vector.multi_reduction <add>, %168, %cst_48 [0] : vector<16x128xf32> to vector<128xf32>
    %170 = vector.shape_cast %169 : vector<128xf32> to vector<1x128xf32>
    %171 = vector.broadcast %2 : f32 to vector<1x128xf32>
    %172 = arith.mulf %170, %171 : vector<1x128xf32>
    %173 = vector.broadcast %164 : vector<1x128xf32> to vector<16x128xf32>
    %174 = arith.subf %159, %173 : vector<16x128xf32>
    %cst_49 = arith.constant 9.99999974E-6 : f32
    %175 = vector.broadcast %cst_49 : f32 to vector<1x128xf32>
    %176 = arith.addf %172, %175 : vector<1x128xf32>
    %177 = math.rsqrt %176 : vector<1x128xf32>
    %178 = vector.broadcast %177 : vector<1x128xf32> to vector<16x128xf32>
    %179 = arith.mulf %174, %178 : vector<16x128xf32>
    %180 = vector.broadcast %144 : vector<1x128xf32> to vector<16x128xf32>
    %181 = arith.mulf %179, %180 : vector<16x128xf32>
    %182 = vector.broadcast %145 : vector<1x128xf32> to vector<16x128xf32>
    %183 = arith.addf %181, %182 : vector<16x128xf32>
    %184 = arith.mulf %183, %4 : vector<16x128xf32>
    %c0_50 = arith.constant 0 : index
    %c0_51 = arith.constant 0 : index
    %185 = vector.load %arg12[%c0_50, %c0_51] : memref<16x128xf32, #tpu.memory_space<vmem>>, vector<16x128xf32>
    tpu.vector_store %arg12[%c0_50, %c0_51], %184 {strides = array<i32>} : memref<16x128xf32, #tpu.memory_space<vmem>>, vector<16x128xf32>,
    return
  }
}

</mosaic_0001>

<bundles_post_ra>
// kernel: tpu_custom_call.1
= control target key start
LH: loop header
LB: loop body
LE: loop exit
PB: predicated region body
PF: predicated region fallthrough
CT: control target
= control target key end

     0   :  { %18 = vsyncpa [#allocation4], 0  ;;  %s2081_s0 = inlined_call_operand.vmem [shape: f32[16,128], index: 0, kind: input, shape index: {}]   ;;  %s2082_s1 = inlined_call_operand.vmem [shape: bf16[16,16], index: 1, kind: input, shape index: {}]   ;;  %s2083_s2 = inlined_call_operand.vmem [shape: f32[16,1], index: 2, kind: input, shape index: {}]   ;;  %s2084_s3 = inlined_call_operand.<no memory space> [shape: f32[1,1], index: 3, kind: input, shape index: {}]   ;;  %s2085_s4 = inlined_call_operand.hbm [shape: bf16[128,256], index: 4, kind: input, shape index: {}]   ;;  %s2086_s5 = inlined_call_operand.vmem [shape: f32[3,256], index: 5, kind: input, shape index: {}]   ;;  %s2087_s6 = inlined_call_operand.hbm [shape: bf16[256,128], index: 6, kind: input, shape index: {}]   ;;  %s2088_s7 = inlined_call_operand.hbm [shape: f32[3,128], index: 7, kind: input, shape index: {}]   ;;  %s2089_s8 = inlined_call_operand.hbm [shape: bf16[128,256], index: 8, kind: input, shape index: {}]   ;;  %s2090_s9 = inlined_call_operand.vmem [shape: f32[3,256], index: 9, kind: input, shape index: {}]   ;;  %s2091_s10 = inlined_call_operand.hbm [shape: bf16[256,128], index: 10, kind: input, shape index: {}]   ;;  %s2092_s11 = inlined_call_operand.vmem [shape: f32[3,128], index: 11, kind: input, shape index: {}]   ;;  %s2093_s12 = inlined_call_operand.hbm [shape: f32[16,128], index: 12, kind: output, shape index: {}]  }
   0x1   :  { %19 = vsyncpa [#allocation7], 0 }
   0x2   :  { %20 = vsyncpa [#allocation10], 0 }
   0x3   :  { %21 = vsyncpa [#allocation5], 0  ;;  %s1750_s21 = smov [#allocation6]   ;;  %s1610_s25 = scalar_lea.hbm %s2087_s6, 2048 }
   0x4   :  { %s49_s22 = sshll.u32 %s1750_s21, 4  ;;  %p1611_p0 = scmp.ne.s32.totalorder %s2087_s6, %s1610_s25  ;;  %s50_s22 = int_to_ptr.vmem [resolvable:$true] %s49_s22 }
   0x5   :  { %p1614_p1 = scmp.lt.u32.totalorder %s1610_s25, %s2087_s6 }
   0x7   :  { %p1616_p2 = pnand %p1614_p1, %p1611_p0 }
   0x9   :  { %1619 = shalt.err (!%p1616_p2)
}
   0xa   :  { %s1620_s30 = scalar_lea.vmem %s50_s22, 2048  ;;  %p1625_p4 = scmp.lt.s32.totalorder %s50_s22, %s50_s22 }
   0xb   :  { %p1621_p3 = scmp.ne.s32.totalorder %s50_s22, %s1620_s30  ;;  %p1626_p5 = scmp.lt.s32.totalorder %s1620_s30, %s1620_s30 }
   0xd   :  { %p1627_p6 = por %p1626_p5, %p1625_p4 }
   0xf   :  { %p1628_p7 = pnand %p1627_p6, %p1621_p3 }
  0x11   :  { %1631 = shalt.err (!%p1628_p7)
}
  0x12   :  { %s1751_s13 = smov 64   ;;  %s1752_s14 = smov 4  }
  0x13   :  { %55 = dma.hbm_to_vmem [thread:$0]  %s2087_s6, 2048, %s50_s22, [#allocation7], %s1751_s13, %s1751_s13, %s1752_s14  }
  0x14   :  { %s1753_s17 = smov [#allocation9]   ;;  %s1754_s19 = smov [#allocation3]  }
  0x15   :  { %s71_s18 = sshll.u32 %s1753_s17, 4  ;;  %s35_s20 = sshll.u32 %s1754_s19, 4  ;;  %s72_s18 = int_to_ptr.vmem [resolvable:$true] %s71_s18  ;;  %s36_s20 = int_to_ptr.vmem [resolvable:$true] %s35_s20 }
  0x16   :  { %s1632_s24 = scalar_lea.hbm %s2089_s8, 2048 }
  0x17   :  { %p1633_p8 = scmp.ne.s32.totalorder %s2089_s8, %s1632_s24  ;;  %p1636_p9 = scmp.lt.u32.totalorder %s1632_s24, %s2089_s8 }
  0x19   :  { %p1638_p10 = pnand %p1636_p9, %p1633_p8 }
  0x1b   :  { %1641 = shalt.err (!%p1638_p10)
}
  0x1c   :  { %s1642_s6 = scalar_lea.vmem %s72_s18, 2048  ;;  %p1647_p12 = scmp.lt.s32.totalorder %s72_s18, %s72_s18 }
  0x1d   :  { %p1643_p11 = scmp.ne.s32.totalorder %s72_s18, %s1642_s6  ;;  %p1648_p13 = scmp.lt.s32.totalorder %s1642_s6, %s1642_s6 }
  0x1f   :  { %p1649_p0 = por %p1648_p13, %p1647_p12 }
  0x21   :  { %p1650_p1 = pnand %p1649_p0, %p1643_p11 }
  0x23   :  { %1653 = shalt.err (!%p1650_p1)
}
  0x24   :  { %s1755_s22 = smov 128   ;;  %s1756_s29 = smov 8  }
  0x25   :  { %77 = dma.hbm_to_vmem [thread:$0]  %s2089_s8, 2048, %s72_s18, [#allocation10], %s1755_s22, %s1755_s22, %s1756_s29  }
  0x26   :  { %s1654_s19 = scalar_lea.hbm %s2085_s4, 2048 }
  0x27   :  { %p1655_p2 = scmp.ne.s32.totalorder %s2085_s4, %s1654_s19  ;;  %p1658_p3 = scmp.lt.u32.totalorder %s1654_s19, %s2085_s4 }
  0x29   :  { %p1660_p4 = pnand %p1658_p3, %p1655_p2 }
  0x2b   :  { %1663 = shalt.err (!%p1660_p4)
}
  0x2c   :  { %s1664_s26 = scalar_lea.vmem %s36_s20, 2048  ;;  %p1669_p6 = scmp.lt.s32.totalorder %s36_s20, %s36_s20 }
  0x2d   :  { %p1665_p5 = scmp.ne.s32.totalorder %s36_s20, %s1664_s26  ;;  %p1670_p7 = scmp.lt.s32.totalorder %s1664_s26, %s1664_s26 }
  0x2f   :  { %p1671_p8 = por %p1670_p7, %p1669_p6 }
  0x31   :  { %p1672_p9 = pnand %p1671_p8, %p1665_p5 }
  0x33   :  { %1675 = shalt.err (!%p1672_p9)
}
  0x34   :  { %41 = dma.hbm_to_vmem [thread:$0]  %s2085_s4, 2048, %s36_s20, [#allocation4], %s1755_s22, %s1755_s22, %s1756_s29  }
  0x35   :  { %s1757_s27 = smov [#allocation8]   ;;  %s1758_s6 = smov [#allocation11]  }
  0x36   :  { %s62_s28 = sshll.u32 %s1757_s27, 4  ;;  %s85_s30 = sshll.u32 %s1758_s6, 4  ;;  %s63_s28 = int_to_ptr.vmem [resolvable:$true] %s62_s28  ;;  %s86_s30 = int_to_ptr.vmem [resolvable:$true] %s85_s30 }
  0x37   :  { %s1676_s17 = scalar_lea.hbm %s2088_s7, 64 }
  0x38   :  { %p1677_p10 = scmp.ne.s32.totalorder %s2088_s7, %s1676_s17  ;;  %p1680_p11 = scmp.lt.u32.totalorder %s1676_s17, %s2088_s7 }
  0x3a   :  { %p1682_p12 = pnand %p1680_p11, %p1677_p10 }
  0x3c   :  { %1685 = shalt.err (!%p1682_p12)
}
  0x3d   :  { %s1686_s4 = scalar_lea.vmem %s63_s28, 64  ;;  %p1691_p0 = scmp.lt.s32.totalorder %s63_s28, %s63_s28 }
  0x3e   :  { %p1687_p13 = scmp.ne.s32.totalorder %s63_s28, %s1686_s4  ;;  %p1692_p1 = scmp.lt.s32.totalorder %s1686_s4, %s1686_s4 }
  0x40   :  { %p1693_p2 = por %p1692_p1, %p1691_p0 }
  0x42   :  { %p1694_p3 = pnand %p1693_p2, %p1687_p13 }
  0x44   :  { %1697 = shalt.err (!%p1694_p3)
}
  0x45   :  { %65 = dma.hbm_to_vmem [thread:$0]  %s2088_s7, 64, %s63_s28, [#allocation7]  }
  0x46   :  { %s1698_s18 = scalar_lea.hbm %s2091_s10, 2048 }
  0x47   :  { %p1699_p4 = scmp.ne.s32.totalorder %s2091_s10, %s1698_s18  ;;  %p1702_p5 = scmp.lt.u32.totalorder %s1698_s18, %s2091_s10 }
  0x49   :  { %p1704_p6 = pnand %p1702_p5, %p1699_p4 }
  0x4b   :  { %1707 = shalt.err (!%p1704_p6)
}
  0x4c   :  { %s1708_s17 = scalar_lea.vmem %s86_s30, 2048  ;;  %p1713_p8 = scmp.lt.s32.totalorder %s86_s30, %s86_s30 }
  0x4d   :  { %p1709_p7 = scmp.ne.s32.totalorder %s86_s30, %s1708_s17  ;;  %p1714_p9 = scmp.lt.s32.totalorder %s1708_s17, %s1708_s17 }
  0x4f   :  { %p1715_p10 = por %p1714_p9, %p1713_p8 }
  0x51   :  { %p1716_p11 = pnand %p1715_p10, %p1709_p7 }
  0x53   :  { %1719 = shalt.err (!%p1716_p11)
}
  0x54   :  { %91 = dma.hbm_to_vmem [thread:$0]  %s2091_s10, 2048, %s86_s30, [#allocation10], %s1751_s13, %s1751_s13, %s1752_s14  }
  0x55   :  { %1742 = dma.done.wait [#allocation4], 2048  }
  0x56   :  { %1743 = vsyncadd [#allocation4], 4294965248 }
  0x57   :  { %1744 = dma.done.wait [#allocation7], 2112  }
  0x58   :  { %1745 = vsyncadd [#allocation7], 4294965184 }
  0x59   :  { %1746 = dma.done.wait [#allocation10], 4096  }
  0x5a   :  { %1747 = vsyncadd [#allocation10], 4294963200  ;;  %v1759_v0 = vmov 0   ;;  %v112_v1 = vld [vmem:[%s2083_s2] sm:$0xff]  ;;  %v113_v2 = vld [vmem:[%s2083_s2 + $0x8] sm:$0xff]  ;;  %v1760_v3 = vmov 0.0   ;;  %v199_v33 = vlaneseq }
  0x5b   :  { %1500 = vset.pattern.permute.xlu0 %v1759_v0  ;;  %530 = vmatprep.mubr.bf16.mxu0 %v1759_v0  ;;  %vm1761_vm0 = vmmov 0   ;;  %v125_v5 = vld [vmem:[%s2081_s0] sm:$0xff]  ;;  %v126_v6 = vld [vmem:[%s2081_s0 + $0x8] sm:$0xff]  ;;  %vm152_vm1 = vcmask 130048   ;;  %v1507_v14 = vld [vmem:[#allocation3 + $0x14] ss:$8 sps:$4 sm:$0xff]  }
  0x5c   :  { %117 = vperm.xlu0 %1500, %v112_v1   ;;  %1475 = vmatprep.subr.bf16.mxu1 %v1760_v3  ;;  %v1504_v10 = vld [vmem:[#allocation3 + $0x4] ss:$8 sps:$4 sm:$0xff]   ;;  %v1502_v13 = vld [vmem:[#allocation3] ss:$8 sps:$4 sm:$0xff]   ;;  %v1505_v15 = vld [vmem:[#allocation3 + $0x10] ss:$8 sps:$4 sm:$0xff]  }
  0x5d   :  { %1477 = vmatprep.mubr.msk.bf16.mxu1 %vm1761_vm0, %v1760_v3  ;;  %v1924_v12 = vld [vmem:[%s2082_s1] sm:$0xff]   ;;  %v1513_v18 = vld [vmem:[#allocation3 + $0x34] ss:$8 sps:$4 sm:$0xff]   ;;  %v1511_v19 = vld [vmem:[#allocation3 + $0x30] ss:$8 sps:$4 sm:$0xff]   ;;  %v1930_v34 = vshrl.u32 %v199_v33, 7 }
  0x5e   :  { %v1510_v16 = vld [vmem:[#allocation3 + $0x24] ss:$8 sps:$4 sm:$0xff]   ;;  %v1508_v17 = vld [vmem:[#allocation3 + $0x20] ss:$8 sps:$4 sm:$0xff]   ;;  %v1519_v22 = vld [vmem:[#allocation3 + $0x54] ss:$8 sps:$4 sm:$0xff]  }
  0x5f   :  { %v1516_v20 = vld [vmem:[#allocation3 + $0x44] ss:$8 sps:$4 sm:$0xff]   ;;  %v1514_v21 = vld [vmem:[#allocation3 + $0x40] ss:$8 sps:$4 sm:$0xff]   ;;  %v1517_v23 = vld [vmem:[#allocation3 + $0x50] ss:$8 sps:$4 sm:$0xff]  }
  0x60   :  { %122 = vperm.xlu0 %1500, %v113_v2   ;;  %v1522_v24 = vld [vmem:[#allocation3 + $0x64] ss:$8 sps:$4 sm:$0xff]   ;;  %v1520_v25 = vld [vmem:[#allocation3 + $0x60] ss:$8 sps:$4 sm:$0xff]   ;;  %v1525_v26 = vld [vmem:[#allocation3 + $0x74] ss:$8 sps:$4 sm:$0xff]  }
  0x61   :  { %v1523_v27 = vld [vmem:[#allocation3 + $0x70] ss:$8 sps:$4 sm:$0xff]   ;;  %v1933_v35 = vsub.s32 0, %v1930_v34  ;;  %v1938_v36 = vld [vmem:[%s2086_s5] sm:$0x77]  ;;  %v205_v37 = vsub.s32 4, %v1930_v34 }
  0x63   :  { %v202_v38 = vrot.slane %v1938_v36, %v1933_v35  ;;  %v206_v39 = vrot.slane %v1938_v36, %v205_v37 }
  0x65   :  { %v212_v40 = vrot.slane %v202_v38, %v1933_v35  ;;  %v216_v41 = vrot.slane %v206_v39, %v1933_v35 }
  0xdb   :  { %v1909_v4 = vpop.permute.xlu0 %117 }
  0xdc   :  { %v127_v8 = vmul.f32 %v125_v5, %v1909_v4 }
  0xdf   :  { %v1917_v7 = vpop.permute.xlu0 %122 }
  0xe0   :  { %v128_v9 = vmul.f32 %v126_v6, %v1917_v7 }
  0xe2   :  { %v146_v11 = vpack.c.bf16 %v128_v9, %v127_v8 }
  0xe4   :  { %1476 = vmatpush3.bf16.msra.mxu1 %v146_v11 }
  0xe5   :  { %297 = vmatprep.subr.bf16.mxu1 %v1504_v10 }
  0xe7   :  { %1478 = vmatmul.mubr.msk.bf16.vlgmr.msra.gmra.mrb[0].mxu1 %vm152_vm1, %v1924_v12 }
  0xe8   :  { %298 = vmatpush1.bf16.msra.mxu1 %v1502_v13  ;;  %329 = vmatprep.mubr.bf16.mxu1 %v1759_v0 }
  0xe9   :  { %299 = vmatprep.subr.bf16.mxu1 %v1507_v14 }
  0xec   :  { %300 = vmatpush1.bf16.msra.mxu1 %v1505_v15 }
  0xed   :  { %301 = vmatprep.subr.bf16.mxu1 %v1510_v16 }
  0xf0   :  { %302 = vmatpush1.bf16.msra.mxu1 %v1508_v17 }
  0xf1   :  { %303 = vmatprep.subr.bf16.mxu1 %v1513_v18 }
  0xf4   :  { %304 = vmatpush1.bf16.msra.mxu1 %v1511_v19 }
  0xf5   :  { %305 = vmatprep.subr.bf16.mxu1 %v1516_v20 }
  0xf8   :  { %306 = vmatpush1.bf16.msra.mxu1 %v1514_v21 }
  0xf9   :  { %307 = vmatprep.subr.bf16.mxu1 %v1519_v22  ;;  %v1955_v22 = vstv %s2084_s3 }
  0xfc   :  { %308 = vmatpush1.bf16.msra.mxu1 %v1517_v23 }
  0xfd   :  { %309 = vmatprep.subr.bf16.mxu1 %v1522_v24 }
 0x100   :  { %310 = vmatpush1.bf16.msra.mxu1 %v1520_v25 }
 0x101   :  { %311 = vmatprep.subr.bf16.mxu1 %v1525_v26 }
 0x104   :  { %312 = vmatpush1.bf16.msra.mxu1 %v1523_v27 }
 0x105   :  { %1481 = vmatprep.subr.bf16.mxu1 %v1760_v3 }
 0x1ba   :  { %v190_v28 = vpop.f32.mrb[0].mxu1 }
 0x1bb   :  { %v1479_v29 = vpop.f32.mrb[1].mxu1 }
 0x1bc   :  { %v193_v30 = vpop.f32.mrb[2].mxu1 }
 0x1bd   :  { %v197_v31 = vpack.c.bf16 %v193_v30, %v190_v28  ;;  %v1480_v32 = vpop.f32.mrb[3].mxu1 }
 0x1bf   :  { %330 = vmatmul.mubr.bf16.vlgmr.msra.gmra.mrb[4].mxu1 %v197_v31 }
 0x1c0   :  { %1483 = vmatprep.mubr.msk.bf16.mxu1 %vm1761_vm0, %v1760_v3 }
 0x292   :  { %v331_v42 = vpop.f32.mrb[4].mxu1 }
 0x293   :  { %v332_v43 = vadd.f32 %v331_v42, %v212_v40  ;;  %v333_v44 = vpop.f32.mrb[5].mxu1 }
 0x294   :  { %v334_v45 = vadd.f32 %v333_v44, %v216_v41  ;;  %v335_v46 = vpop.f32.mrb[6].mxu1 }
 0x295   :  { %v336_v47 = vadd.f32 %v335_v46, %v212_v40  ;;  %v337_v48 = vpop.f32.mrb[7].mxu1  ;;  %v340_v49 = vmul.f32 %v332_v43, %v332_v43 }
 0x296   :  { %v338_v50 = vadd.f32 %v337_v48, %v216_v41  ;;  %v341_v51 = vmul.f32 %v334_v45, %v334_v45 }
 0x297   :  { %v342_v52 = vmul.f32 %v336_v47, %v336_v47 }
 0x298   :  { %v343_v53 = vmul.f32 %v338_v50, %v338_v50  ;;  %v344_v54 = vadd.f32 %v341_v51, %v340_v49 }
 0x29a   :  { %345 = vadd.xlane.f32.xlu1 %v344_v54  ;;  %v347_v55 = vadd.f32 %v343_v53, %v342_v52 }
 0x29e   :  { %348 = vadd.xlane.f32.xlu1 %v347_v55 }
 0x327   :  { %v346_v56 = vpop.xlane.xlu1 %345 }
 0x328   :  { %v350_v57 = vmax.f32 %v346_v56, 1e-24 }
 0x32a   :  { %1582 = vrsqrt.f32 %v350_v57 }
 0x32b   :  { %v349_v58 = vpop.xlane.xlu1 %348 }
 0x32c   :  { %v351_v59 = vmax.f32 %v349_v58, 1e-24 }
 0x32e   :  { %1584 = vrsqrt.f32 %v351_v59 }
 0x334   :  { %v1583_v60 = vpop.eup %1582 }
 0x335   :  { %v354_v61 = vmul.f32 %v1583_v60, %v332_v43  ;;  %v355_v62 = vmul.f32 %v1583_v60, %v334_v45 }
 0x337   :  { %v358_v3 = vmul.f32 %v354_v61, %v1909_v4  ;;  %v359_v6 = vmul.f32 %v355_v62, %v1909_v4 }
 0x338   :  { %v1585_v63 = vpop.eup %1584 }
 0x339   :  { %v356_v1 = vmul.f32 %v1585_v63, %v336_v47  ;;  %v357_v2 = vmul.f32 %v1585_v63, %v338_v50  ;;  %v443_v63 = vsub.s32 6, %v1930_v34 }
 0x33b   :  { %v360_v5 = vmul.f32 %v356_v1, %v1917_v7  ;;  %v361_v8 = vmul.f32 %v357_v2, %v1917_v7 }
 0x33d   :  { %v362_v9 = vadd.f32 %v360_v5, %v358_v3  ;;  %v369_v10 = vadd.f32 %v361_v8, %v359_v6  ;;  %v444_v5 = vrot.slane %v1938_v36, %v443_v63 }
 0x33f   :  { %v363_v11 = vrot.slane %v362_v9, 4  ;;  %v370_v13 = vrot.slane %v369_v10, 4 }
 0x341   :  { %v364_v14 = vadd.f32 %v363_v11, %v362_v9  ;;  %v371_v15 = vadd.f32 %v370_v13, %v369_v10 }
 0x343   :  { %v372_v16 = vrot.slane %v371_v15, 2  ;;  %v365_v17 = vrot.slane %v364_v14, 2 }
 0x345   :  { %v373_v18 = vadd.f32 %v372_v16, %v371_v15  ;;  %v366_v19 = vadd.f32 %v365_v17, %v364_v14 }
 0x347   :  { %v374_v20 = vrot.slane %v373_v18, 1  ;;  %v367_v21 = vrot.slane %v366_v19, 1 }
 0x349   :  { %v375_v23 = vadd.f32 %v374_v20, %v373_v18  ;;  %v368_v24 = vadd.f32 %v367_v21, %v366_v19 }
 0x34b   :  { %v378_v25 = vmul.f32 %v1955_v22, %v375_v23  ;;  %v377_v26 = vmul.f32 %v1955_v22, %v368_v24 }
 0x34d   :  { %v380_v27 = vsub.f32 %v355_v62, %v378_v25  ;;  %v382_v28 = vsub.f32 %v357_v2, %v378_v25  ;;  %v379_v29 = vsub.f32 %v354_v61, %v377_v26  ;;  %v381_v30 = vsub.f32 %v356_v1, %v377_v26 }
 0x34e   :  { %v421_v61 = vsub.s32 5, %v1930_v34  ;;  %v1967_v62 = vsub.s32 1, %v1930_v34  ;;  %v1971_v1 = vsub.s32 2, %v1930_v34 }
 0x34f   :  { %v384_v31 = vmul.f32 %v380_v27, %v1909_v4  ;;  %v386_v32 = vmul.f32 %v382_v28, %v1917_v7  ;;  %v383_v33 = vmul.f32 %v379_v29, %v1909_v4  ;;  %v385_v38 = vmul.f32 %v381_v30, %v1917_v7 }
 0x350   :  { %v422_v2 = vrot.slane %v1938_v36, %v421_v61  ;;  %v418_v3 = vrot.slane %v1938_v36, %v1967_v62  ;;  %v440_v6 = vrot.slane %v1938_v36, %v1971_v1  ;;  %v454_v15 = vrot.slane %v444_v5, %v1971_v1 }
 0x351   :  { %v388_v39 = vmul.f32 %v384_v31, %v384_v31  ;;  %v390_v40 = vmul.f32 %v386_v32, %v386_v32  ;;  %v387_v41 = vmul.f32 %v383_v33, %v383_v33  ;;  %v389_v42 = vmul.f32 %v385_v38, %v385_v38  ;;  %v1527_v38 = vld [vmem:[#allocation6] sm:$0xff]  }
 0x352   :  { %v432_v8 = vrot.slane %v422_v2, %v1967_v62  ;;  %v428_v10 = vrot.slane %v418_v3, %v1967_v62  ;;  %v450_v18 = vrot.slane %v440_v6, %v1971_v1 }
 0x353   :  { %v398_v43 = vadd.f32 %v390_v40, %v388_v39  ;;  %v391_v44 = vadd.f32 %v389_v42, %v387_v41  ;;  %v1528_v39 = vld [vmem:[#allocation6 + $0x48] sm:$0xff]   ;;  %v1530_v41 = vld [vmem:[#allocation6 + $0x50] sm:$0xff]  }
 0x354   :  { %v1529_v40 = vld [vmem:[#allocation6 + $0x8] sm:$0xff]   ;;  %v1531_v42 = vld [vmem:[#allocation6 + $0x10] sm:$0xff]  }
 0x355   :  { %v399_v45 = vrot.slane %v398_v43, 4  ;;  %v392_v46 = vrot.slane %v391_v44, 4 }
 0x357   :  { %v400_v47 = vadd.f32 %v399_v45, %v398_v43  ;;  %v393_v48 = vadd.f32 %v392_v46, %v391_v44  ;;  %v1532_v43 = vld [vmem:[#allocation6 + $0x58] sm:$0xff]   ;;  %v1534_v45 = vld [vmem:[#allocation6 + $0x60] sm:$0xff]  }
 0x358   :  { %v1533_v44 = vld [vmem:[#allocation6 + $0x18] sm:$0xff]   ;;  %v1535_v46 = vld [vmem:[#allocation6 + $0x20] sm:$0xff]  }
 0x359   :  { %v401_v49 = vrot.slane %v400_v47, 2  ;;  %v394_v50 = vrot.slane %v393_v48, 2 }
 0x35b   :  { %v402_v51 = vadd.f32 %v401_v49, %v400_v47  ;;  %v395_v52 = vadd.f32 %v394_v50, %v393_v48  ;;  %v1536_v47 = vld [vmem:[#allocation6 + $0x68] sm:$0xff]   ;;  %v1538_v49 = vld [vmem:[#allocation6 + $0x70] sm:$0xff]  }
 0x35c   :  { %v1537_v48 = vld [vmem:[#allocation6 + $0x28] sm:$0xff]   ;;  %v1539_v50 = vld [vmem:[#allocation6 + $0x30] sm:$0xff]  }
 0x35d   :  { %v403_v53 = vrot.slane %v402_v51, 1  ;;  %v396_v54 = vrot.slane %v395_v52, 1 }
 0x35f   :  { %v404_v55 = vadd.f32 %v403_v53, %v402_v51  ;;  %v397_v56 = vadd.f32 %v396_v54, %v395_v52  ;;  %v1540_v51 = vld [vmem:[#allocation6 + $0x78] sm:$0xff]  }
 0x360   :  { %v1541_v52 = vld [vmem:[#allocation6 + $0x38] sm:$0xff]  }
 0x361   :  { %v406_v57 = vmul.f32 %v404_v55, %v1955_v22  ;;  %v405_v58 = vmul.f32 %v397_v56, %v1955_v22 }
 0x363   :  { %v408_v59 = vadd.f32 1e-05, %v406_v57  ;;  %v407_v60 = vadd.f32 1e-05, %v405_v58 }
 0x365   :  { %1586 = vrsqrt.f32 %v408_v59  ;;  %v495_v59 = vld [vmem:[#allocation8] sm:$0x7] }
 0x366   :  { %1588 = vrsqrt.f32 %v407_v60  ;;  %v546_v2 = vrot.slane %v495_v59, %v1933_v35 }
 0x36f   :  { %v1587_v9 = vpop.eup %1586 }
 0x370   :  { %v1589_v11 = vpop.eup %1588  ;;  %v412_v13 = vmul.f32 %v1587_v9, %v380_v27  ;;  %v414_v14 = vmul.f32 %v1587_v9, %v382_v28 }
 0x371   :  { %v411_v16 = vmul.f32 %v1589_v11, %v379_v29  ;;  %v413_v17 = vmul.f32 %v1589_v11, %v381_v30  ;;  %v1526_v30 = vld [vmem:[#allocation6 + $0x40] sm:$0xff]  }
 0x372   :  { %v434_v19 = vmul.f32 %v432_v8, %v412_v13  ;;  %v436_v20 = vmul.f32 %v432_v8, %v414_v14 }
 0x373   :  { %v433_v21 = vmul.f32 %v428_v10, %v411_v16  ;;  %v435_v23 = vmul.f32 %v428_v10, %v413_v17 }
 0x374   :  { %v456_v24 = vadd.f32 %v454_v15, %v434_v19  ;;  %v458_v36 = vadd.f32 %v454_v15, %v436_v20 }
 0x375   :  { %v455_v25 = vadd.f32 %v450_v18, %v433_v21  ;;  %v457_v26 = vadd.f32 %v450_v18, %v435_v23 }
 0x376   :  { %v460_v31 = vmul.f32 %v456_v24, %v1909_v4  ;;  %v462_v32 = vmul.f32 %v458_v36, %v1917_v7 }
 0x377   :  { %v459_v27 = vmul.f32 %v455_v25, %v1909_v4  ;;  %v461_v28 = vmul.f32 %v457_v26, %v1917_v7 }
 0x378   :  { %v497_v29 = vpack.c.bf16 %v462_v32, %v460_v31 }
 0x379   :  { %v496_v33 = vpack.c.bf16 %v461_v28, %v459_v27 }
 0x37a   :  { %498 = vmatprep.subr.bf16.mxu0 %v497_v29 }
 0x37b   :  { %499 = vmatpush1.bf16.msra.mxu0 %v496_v33 }
 0x37c   :  { %1429 = vmatprep.subr.bf16.mxu0 %v1526_v30 }
 0x37e   :  { %1376 = vmatmul.mubr.msk.bf16.vlgmr.msra.gmra.mrb[0].mxu0 %vm152_vm1, %v1924_v12 }
 0x37f   :  { %1430 = vmatpush3.bf16.msra.mxu0 %v1527_v38 }
 0x380   :  { %1431 = vmatprep.subr.bf16.mxu0 %v1528_v39 }
 0x383   :  { %1432 = vmatpush3.bf16.msra.mxu0 %v1529_v40 }
 0x384   :  { %1433 = vmatprep.subr.bf16.mxu0 %v1530_v41 }
 0x387   :  { %1434 = vmatpush3.bf16.msra.mxu0 %v1531_v42 }
 0x388   :  { %1435 = vmatprep.subr.bf16.mxu0 %v1532_v43 }
 0x38b   :  { %1436 = vmatpush3.bf16.msra.mxu0 %v1533_v44 }
 0x38c   :  { %1437 = vmatprep.subr.bf16.mxu0 %v1534_v45 }
 0x38f   :  { %1438 = vmatpush3.bf16.msra.mxu0 %v1535_v46 }
 0x390   :  { %1439 = vmatprep.subr.bf16.mxu0 %v1536_v47 }
 0x393   :  { %1440 = vmatpush3.bf16.msra.mxu0 %v1537_v48 }
 0x394   :  { %1441 = vmatprep.subr.bf16.mxu0 %v1538_v49 }
 0x397   :  { %1442 = vmatpush3.bf16.msra.mxu0 %v1539_v50 }
 0x398   :  { %1443 = vmatprep.subr.bf16.mxu0 %v1540_v51 }
 0x39b   :  { %1444 = vmatpush3.bf16.msra.mxu0 %v1541_v52  ;;  %v727_v52 = vrot.slane %v495_v59, %v1967_v62 }
 0x451   :  { %v532_v53 = vpop.f32.mrb[0].mxu0 }
 0x452   :  { %v534_v54 = vpop.f32.mrb[1].mxu0 }
 0x453   :  { %v536_v55 = vpop.f32.mrb[2].mxu0 }
 0x454   :  { %v541_v56 = vpack.c.bf16 %v536_v55, %v532_v53  ;;  %v538_v57 = vpop.f32.mrb[3].mxu0 }
 0x455   :  { %v542_v58 = vpack.c.bf16 %v538_v57, %v534_v54  ;;  %v733_v54 = vrot.slane %v495_v59, %v1971_v1  ;;  %v1545_v59 = vld [vmem:[#allocation9 + $0x10] ss:$8 sps:$4 sm:$0xff]  }
 0x457   :  { %675 = vmatprep.mubr.bf16.mxu0 %v542_v58 }
 0x458   :  { %676 = vmatmul.mubr.bf16.vlgmr.msra.gmra.mrb[4].mxu0 %v541_v56 }
 0x459   :  { %1129 = vmatprep.mubr.bf16.mxu0 %v1759_v0 }
 0x52b   :  { %v1445_v60 = vpop.f32.mrb[4].mxu0 }
 0x52c   :  { %v1446_v3 = vpop.f32.mrb[5].mxu0 }
 0x52d   :  { %v1447_v5 = vadd.f32 %v1446_v3, %v1445_v60  ;;  %v1448_v6 = vpop.f32.mrb[6].mxu0 }
 0x52e   :  { %v1449_v8 = vpop.f32.mrb[7].mxu0 }
 0x52f   :  { %v678_v9 = vadd.f32 %v1447_v5, %v546_v2  ;;  %v1450_v10 = vadd.f32 %v1449_v8, %v1448_v6  ;;  %v1544_v6 = vld [vmem:[#allocation9 + $0x4] ss:$8 sps:$4 sm:$0xff]  }
 0x531   :  { %v681_v11 = vadd.f32 %v1450_v10, %v546_v2  ;;  %v684_v13 = vmul.f32 %v678_v9, %v678_v9  ;;  %v1547_v10 = vld [vmem:[#allocation9 + $0x14] ss:$8 sps:$4 sm:$0xff]  }
 0x533   :  { %686 = vadd.xlane.f32.xlu0 %v684_v13  ;;  %v685_v14 = vmul.f32 %v681_v11, %v681_v11  ;;  %v1548_v13 = vld [vmem:[#allocation9 + $0x20] ss:$8 sps:$4 sm:$0xff]  }
 0x535   :  { %688 = vadd.xlane.f32.xlu1 %v685_v14  ;;  %v1553_v14 = vld [vmem:[#allocation9 + $0x34] ss:$8 sps:$4 sm:$0xff]  }
 0x5c0   :  { %v687_v15 = vpop.xlane.xlu0 %686 }
 0x5c1   :  { %v690_v16 = vmax.f32 %v687_v15, 1e-24  ;;  %v1551_v15 = vld [vmem:[#allocation9 + $0x30] ss:$8 sps:$4 sm:$0xff]  }
 0x5c2   :  { %v689_v17 = vpop.xlane.xlu1 %688 }
 0x5c3   :  { %1590 = vrsqrt.f32 %v690_v16  ;;  %v691_v18 = vmax.f32 %v689_v17, 1e-24  ;;  %v1556_v16 = vld [vmem:[#allocation9 + $0x44] ss:$8 sps:$4 sm:$0xff]   ;;  %v1554_v17 = vld [vmem:[#allocation9 + $0x40] ss:$8 sps:$4 sm:$0xff]  }
 0x5c5   :  { %1592 = vrsqrt.f32 %v691_v18  ;;  %v1559_v18 = vld [vmem:[#allocation9 + $0x54] ss:$8 sps:$4 sm:$0xff]  }
 0x5cd   :  { %v1591_v19 = vpop.eup %1590 }
 0x5ce   :  { %v694_v20 = vmul.f32 %v1591_v19, %v678_v9  ;;  %v1542_v9 = vld [vmem:[#allocation9] ss:$8 sps:$4 sm:$0xff]   ;;  %v1557_v19 = vld [vmem:[#allocation9 + $0x50] ss:$8 sps:$4 sm:$0xff]  }
 0x5cf   :  { %v1593_v21 = vpop.eup %1592 }
 0x5d0   :  { %v695_v23 = vmul.f32 %v1593_v21, %v681_v11  ;;  %v696_v24 = vmul.f32 %v694_v20, %v1909_v4  ;;  %v1550_v11 = vld [vmem:[#allocation9 + $0x24] ss:$8 sps:$4 sm:$0xff]   ;;  %v1565_v21 = vld [vmem:[#allocation9 + $0x74] ss:$8 sps:$4 sm:$0xff]  }
 0x5d2   :  { %v697_v36 = vmul.f32 %v695_v23, %v1917_v7 }
 0x5d4   :  { %v698_v25 = vadd.f32 %v697_v36, %v696_v24 }
 0x5d6   :  { %v699_v26 = vrot.slane %v698_v25, 4 }
 0x5d8   :  { %v700_v31 = vadd.f32 %v699_v26, %v698_v25 }
 0x5da   :  { %v701_v32 = vrot.slane %v700_v31, 2 }
 0x5dc   :  { %v702_v27 = vadd.f32 %v701_v32, %v700_v31  ;;  %v2011_v32 = vld [vmem:[%s2090_s9] sm:$0x77] }
 0x5de   :  { %v703_v28 = vrot.slane %v702_v27, 1 }
 0x5e0   :  { %v704_v29 = vadd.f32 %v703_v28, %v702_v27  ;;  %v802_v27 = vrot.slane %v2011_v32, %v1933_v35  ;;  %v806_v28 = vrot.slane %v2011_v32, %v205_v37 }
 0x5e2   :  { %v705_v30 = vmul.f32 %v704_v29, %v1955_v22  ;;  %v812_v29 = vrot.slane %v802_v27, %v1933_v35 }
 0x5e4   :  { %v707_v33 = vsub.f32 %v695_v23, %v705_v30  ;;  %v706_v38 = vsub.f32 %v694_v20, %v705_v30  ;;  %v1562_v20 = vld [vmem:[#allocation9 + $0x64] ss:$8 sps:$4 sm:$0xff]   ;;  %v1563_v23 = vld [vmem:[#allocation9 + $0x70] ss:$8 sps:$4 sm:$0xff]   ;;  %v816_v30 = vrot.slane %v806_v28, %v1933_v35 }
 0x5e6   :  { %v709_v39 = vmul.f32 %v707_v33, %v1917_v7  ;;  %v708_v40 = vmul.f32 %v706_v38, %v1909_v4 }
 0x5e8   :  { %v711_v41 = vmul.f32 %v709_v39, %v709_v39  ;;  %v710_v42 = vmul.f32 %v708_v40, %v708_v40 }
 0x5ea   :  { %v712_v43 = vadd.f32 %v711_v41, %v710_v42 }
 0x5ec   :  { %v713_v44 = vrot.slane %v712_v43, 4 }
 0x5ee   :  { %v714_v45 = vadd.f32 %v713_v44, %v712_v43 }
 0x5f0   :  { %v715_v46 = vrot.slane %v714_v45, 2 }
 0x5f2   :  { %v716_v47 = vadd.f32 %v715_v46, %v714_v45 }
 0x5f4   :  { %v717_v48 = vrot.slane %v716_v47, 1 }
 0x5f6   :  { %v718_v49 = vadd.f32 %v717_v48, %v716_v47 }
 0x5f8   :  { %v719_v50 = vmul.f32 %v718_v49, %v1955_v22 }
 0x5fa   :  { %v720_v51 = vadd.f32 1e-05, %v719_v50 }
 0x5fc   :  { %1594 = vrsqrt.f32 %v720_v51 }
 0x606   :  { %v1595_v53 = vpop.eup %1594 }
 0x607   :  { %v722_v55 = vmul.f32 %v1595_v53, %v706_v38  ;;  %v723_v56 = vmul.f32 %v1595_v53, %v707_v33 }
 0x609   :  { %v728_v57 = vmul.f32 %v727_v52, %v722_v55  ;;  %v729_v58 = vmul.f32 %v727_v52, %v723_v56 }
 0x60b   :  { %v734_v60 = vadd.f32 %v733_v54, %v728_v57  ;;  %v735_v2 = vadd.f32 %v733_v54, %v729_v58 }
 0x60d   :  { %v736_v3 = vmul.f32 %v734_v60, %v1909_v4  ;;  %v737_v5 = vmul.f32 %v735_v2, %v1917_v7 }
 0x60f   :  { %v755_v8 = vpack.c.bf16 %v737_v5, %v736_v3 }
 0x611   :  { %1482 = vmatpush3.bf16.msra.mxu1 %v755_v8 }
 0x612   :  { %897 = vmatprep.subr.bf16.mxu1 %v1544_v6 }
 0x614   :  { %1484 = vmatmul.mubr.msk.bf16.vlgmr.msra.gmra.mrb[8].mxu1 %vm152_vm1, %v1924_v12 }
 0x615   :  { %898 = vmatpush1.bf16.msra.mxu1 %v1542_v9  ;;  %929 = vmatprep.mubr.bf16.mxu1 %v1759_v0  ;;  %v1560_v0 = vld [vmem:[#allocation9 + $0x60] ss:$8 sps:$4 sm:$0xff]  }
 0x616   :  { %899 = vmatprep.subr.bf16.mxu1 %v1547_v10 }
 0x619   :  { %900 = vmatpush1.bf16.msra.mxu1 %v1545_v59 }
 0x61a   :  { %901 = vmatprep.subr.bf16.mxu1 %v1550_v11 }
 0x61d   :  { %902 = vmatpush1.bf16.msra.mxu1 %v1548_v13 }
 0x61e   :  { %903 = vmatprep.subr.bf16.mxu1 %v1553_v14 }
 0x621   :  { %904 = vmatpush1.bf16.msra.mxu1 %v1551_v15 }
 0x622   :  { %905 = vmatprep.subr.bf16.mxu1 %v1556_v16 }
 0x625   :  { %906 = vmatpush1.bf16.msra.mxu1 %v1554_v17 }
 0x626   :  { %907 = vmatprep.subr.bf16.mxu1 %v1559_v18 }
 0x629   :  { %908 = vmatpush1.bf16.msra.mxu1 %v1557_v19 }
 0x62a   :  { %909 = vmatprep.subr.bf16.mxu1 %v1562_v20 }
 0x62d   :  { %910 = vmatpush1.bf16.msra.mxu1 %v1560_v0 }
 0x62e   :  { %911 = vmatprep.subr.bf16.mxu1 %v1565_v21 }
 0x631   :  { %912 = vmatpush1.bf16.msra.mxu1 %v1563_v23 }
 0x6e7   :  { %v790_v24 = vpop.f32.mrb[8].mxu1 }
 0x6e8   :  { %v1485_v36 = vpop.f32.mrb[9].mxu1 }
 0x6e9   :  { %v793_v25 = vpop.f32.mrb[10].mxu1 }
 0x6ea   :  { %v797_v26 = vpack.c.bf16 %v793_v25, %v790_v24  ;;  %v1486_v31 = vpop.f32.mrb[11].mxu1 }
 0x6ec   :  { %930 = vmatmul.mubr.bf16.vlgmr.msra.gmra.mrb[12].mxu1 %v797_v26 }
 0x7bf   :  { %v931_v33 = vpop.f32.mrb[12].mxu1 }
 0x7c0   :  { %v932_v38 = vadd.f32 %v931_v33, %v812_v29  ;;  %v933_v39 = vpop.f32.mrb[13].mxu1 }
 0x7c1   :  { %v934_v40 = vadd.f32 %v933_v39, %v816_v30  ;;  %v935_v41 = vpop.f32.mrb[14].mxu1 }
 0x7c2   :  { %v940_v42 = vmul.f32 %v932_v38, %v932_v38  ;;  %v936_v43 = vadd.f32 %v935_v41, %v812_v29  ;;  %v937_v44 = vpop.f32.mrb[15].mxu1 }
 0x7c3   :  { %v941_v45 = vmul.f32 %v934_v40, %v934_v40  ;;  %v938_v46 = vadd.f32 %v937_v44, %v816_v30 }
 0x7c4   :  { %v942_v47 = vmul.f32 %v936_v43, %v936_v43 }
 0x7c5   :  { %v943_v48 = vmul.f32 %v938_v46, %v938_v46  ;;  %v944_v49 = vadd.f32 %v941_v45, %v940_v42 }
 0x7c7   :  { %945 = vadd.xlane.f32.xlu1 %v944_v49  ;;  %v947_v50 = vadd.f32 %v943_v48, %v942_v47 }
 0x7cb   :  { %948 = vadd.xlane.f32.xlu1 %v947_v50 }
 0x854   :  { %v946_v37 = vpop.xlane.xlu1 %945 }
 0x855   :  { %v950_v51 = vmax.f32 %v946_v37, 1e-24 }
 0x857   :  { %1596 = vrsqrt.f32 %v950_v51 }
 0x858   :  { %v949_v52 = vpop.xlane.xlu1 %948 }
 0x859   :  { %v951_v53 = vmax.f32 %v949_v52, 1e-24 }
 0x85b   :  { %1598 = vrsqrt.f32 %v951_v53 }
 0x861   :  { %v1597_v54 = vpop.eup %1596 }
 0x862   :  { %v954_v55 = vmul.f32 %v1597_v54, %v932_v38  ;;  %v955_v56 = vmul.f32 %v1597_v54, %v934_v40 }
 0x864   :  { %v958_v2 = vmul.f32 %v954_v55, %v1909_v4  ;;  %v959_v3 = vmul.f32 %v955_v56, %v1909_v4 }
 0x865   :  { %v1599_v57 = vpop.eup %1598 }
 0x866   :  { %v956_v58 = vmul.f32 %v1599_v57, %v936_v43  ;;  %v957_v60 = vmul.f32 %v1599_v57, %v938_v46  ;;  %v1021_v57 = vrot.slane %v2011_v32, %v421_v61 }
 0x868   :  { %v960_v5 = vmul.f32 %v956_v58, %v1917_v7  ;;  %v961_v6 = vmul.f32 %v957_v60, %v1917_v7 }
 0x86a   :  { %v962_v8 = vadd.f32 %v960_v5, %v958_v2  ;;  %v969_v9 = vadd.f32 %v961_v6, %v959_v3  ;;  %v1039_v2 = vrot.slane %v2011_v32, %v1971_v1  ;;  %v1031_v3 = vrot.slane %v1021_v57, %v1967_v62 }
 0x86c   :  { %v963_v10 = vrot.slane %v962_v8, 4  ;;  %v970_v59 = vrot.slane %v969_v9, 4 }
 0x86e   :  { %v964_v11 = vadd.f32 %v963_v10, %v962_v8  ;;  %v971_v13 = vadd.f32 %v970_v59, %v969_v9 }
 0x870   :  { %v965_v14 = vrot.slane %v964_v11, 2  ;;  %v972_v15 = vrot.slane %v971_v13, 2 }
 0x872   :  { %v966_v16 = vadd.f32 %v965_v14, %v964_v11  ;;  %v973_v17 = vadd.f32 %v972_v15, %v971_v13  ;;  %v1049_v13 = vrot.slane %v1039_v2, %v1971_v1 }
 0x874   :  { %v967_v18 = vrot.slane %v966_v16, 1  ;;  %v974_v19 = vrot.slane %v973_v17, 1 }
 0x876   :  { %v968_v20 = vadd.f32 %v967_v18, %v966_v16  ;;  %v975_v0 = vadd.f32 %v974_v19, %v973_v17 }
 0x878   :  { %v976_v21 = vmul.f32 %v968_v20, %v1955_v22  ;;  %v977_v23 = vmul.f32 %v975_v0, %v1955_v22 }
 0x87a   :  { %v980_v24 = vsub.f32 %v956_v58, %v976_v21  ;;  %v979_v36 = vsub.f32 %v955_v56, %v977_v23  ;;  %v981_v25 = vsub.f32 %v957_v60, %v977_v23  ;;  %v978_v26 = vsub.f32 %v954_v55, %v976_v21 }
 0x87b   :  { %v1017_v58 = vrot.slane %v2011_v32, %v1967_v62  ;;  %v1043_v60 = vrot.slane %v2011_v32, %v443_v63 }
 0x87c   :  { %v984_v31 = vmul.f32 %v980_v24, %v1917_v7  ;;  %v983_v27 = vmul.f32 %v979_v36, %v1909_v4  ;;  %v985_v28 = vmul.f32 %v981_v25, %v1917_v7  ;;  %v982_v29 = vmul.f32 %v978_v26, %v1909_v4 }
 0x87d   :  { %v1027_v6 = vrot.slane %v1017_v58, %v1967_v62  ;;  %v1053_v61 = vrot.slane %v1043_v60, %v1971_v1 }
 0x87e   :  { %v988_v30 = vmul.f32 %v984_v31, %v984_v31  ;;  %v987_v33 = vmul.f32 %v983_v27, %v983_v27  ;;  %v989_v38 = vmul.f32 %v985_v28, %v985_v28  ;;  %v986_v39 = vmul.f32 %v982_v29, %v982_v29  ;;  %v1569_v31 = vld [vmem:[#allocation11 + $0x8] sm:$0xff]   ;;  %v1570_v27 = vld [vmem:[#allocation11 + $0x50] sm:$0xff]   ;;  %v1572_v29 = vld [vmem:[#allocation11 + $0x58] sm:$0xff]  }
 0x87f   :  { %v1571_v28 = vld [vmem:[#allocation11 + $0x10] sm:$0xff]  }
 0x880   :  { %v997_v40 = vadd.f32 %v989_v38, %v987_v33  ;;  %v990_v41 = vadd.f32 %v988_v30, %v986_v39  ;;  %v1573_v30 = vld [vmem:[#allocation11 + $0x18] sm:$0xff]   ;;  %v1574_v33 = vld [vmem:[#allocation11 + $0x60] sm:$0xff]   ;;  %v1576_v39 = vld [vmem:[#allocation11 + $0x68] sm:$0xff]  }
 0x881   :  { %v1575_v38 = vld [vmem:[#allocation11 + $0x20] sm:$0xff]  }
 0x882   :  { %v998_v42 = vrot.slane %v997_v40, 4  ;;  %v991_v43 = vrot.slane %v990_v41, 4 }
 0x884   :  { %v999_v44 = vadd.f32 %v998_v42, %v997_v40  ;;  %v992_v45 = vadd.f32 %v991_v43, %v990_v41  ;;  %v1577_v40 = vld [vmem:[#allocation11 + $0x28] sm:$0xff]   ;;  %v1579_v41 = vld [vmem:[#allocation11 + $0x30] sm:$0xff]   ;;  %v1580_v42 = vld [vmem:[#allocation11 + $0x78] sm:$0xff]  }
 0x885   :  { %v1581_v43 = vld [vmem:[#allocation11 + $0x38] sm:$0xff]  }
 0x886   :  { %v1000_v46 = vrot.slane %v999_v44, 2  ;;  %v993_v47 = vrot.slane %v992_v45, 2 }
 0x888   :  { %v1001_v48 = vadd.f32 %v1000_v46, %v999_v44  ;;  %v994_v49 = vadd.f32 %v993_v47, %v992_v45 }
 0x88a   :  { %v1002_v50 = vrot.slane %v1001_v48, 1  ;;  %v995_v37 = vrot.slane %v994_v49, 1 }
 0x88c   :  { %v1003_v51 = vadd.f32 %v1002_v50, %v1001_v48  ;;  %v996_v52 = vadd.f32 %v995_v37, %v994_v49  ;;  %v1094_v50 = vld [vmem:[%s2092_s11] sm:$0x7]  ;;  %s1762_s11 = smov [#allocation12]  }
 0x88d   :  { %s1344_s8 = sshll.u32 %s1762_s11, 4  ;;  %s1345_s8 = int_to_ptr.vmem [resolvable:$true] %s1344_s8 }
 0x88e   :  { %v1005_v53 = vmul.f32 %v1003_v51, %v1955_v22  ;;  %v1004_v54 = vmul.f32 %v996_v52, %v1955_v22  ;;  %v1145_v51 = vrot.slane %v1094_v50, %v1933_v35  ;;  %s1720_s18 = scalar_lea.vmem %s1345_s8, 256  ;;  %p1725_p13 = scmp.lt.s32.totalorder %s1345_s8, %s1345_s8 }
 0x88f   :  { %p1721_p12 = scmp.ne.s32.totalorder %s1345_s8, %s1720_s18  ;;  %p1726_p0 = scmp.lt.s32.totalorder %s1720_s18, %s1720_s18 }
 0x890   :  { %v1007_v55 = vadd.f32 1e-05, %v1005_v53  ;;  %v1006_v56 = vadd.f32 1e-05, %v1004_v54 }
 0x891   :  { %p1727_p1 = por %p1726_p0, %p1725_p13 }
 0x892   :  { %1600 = vrsqrt.f32 %v1007_v55 }
 0x893   :  { %1602 = vrsqrt.f32 %v1006_v56  ;;  %p1728_p2 = pnand %p1727_p1, %p1721_p12 }
 0x89c   :  { %v1601_v5 = vpop.eup %1600 }
 0x89d   :  { %v1603_v8 = vpop.eup %1602  ;;  %v1011_v9 = vmul.f32 %v1601_v5, %v979_v36  ;;  %v1013_v10 = vmul.f32 %v1601_v5, %v981_v25  ;;  %v1567_v25 = vld [vmem:[#allocation11] sm:$0xff]  }
 0x89e   :  { %v1010_v59 = vmul.f32 %v1603_v8, %v978_v26  ;;  %v1012_v11 = vmul.f32 %v1603_v8, %v980_v24  ;;  %v1566_v24 = vld [vmem:[#allocation11 + $0x40] sm:$0xff]   ;;  %v1568_v26 = vld [vmem:[#allocation11 + $0x48] sm:$0xff]  }
 0x89f   :  { %v1033_v34 = vmul.f32 %v1031_v3, %v1011_v9  ;;  %v1035_v14 = vmul.f32 %v1031_v3, %v1013_v10 }
 0x8a0   :  { %v1032_v63 = vmul.f32 %v1027_v6, %v1010_v59  ;;  %v1034_v15 = vmul.f32 %v1027_v6, %v1012_v11 }
 0x8a1   :  { %v1055_v16 = vadd.f32 %v1053_v61, %v1033_v34  ;;  %v1057_v32 = vadd.f32 %v1053_v61, %v1035_v14 }
 0x8a2   :  { %v1054_v17 = vadd.f32 %v1049_v13, %v1032_v63  ;;  %v1056_v18 = vadd.f32 %v1049_v13, %v1034_v15 }
 0x8a3   :  { %v1059_v19 = vmul.f32 %v1055_v16, %v1909_v4  ;;  %v1061_v20 = vmul.f32 %v1057_v32, %v1917_v7 }
 0x8a4   :  { %v1058_v0 = vmul.f32 %v1054_v17, %v1909_v4  ;;  %v1060_v21 = vmul.f32 %v1056_v18, %v1917_v7 }
 0x8a5   :  { %v1096_v23 = vpack.c.bf16 %v1061_v20, %v1059_v19 }
 0x8a6   :  { %v1095_v36 = vpack.c.bf16 %v1060_v21, %v1058_v0 }
 0x8a7   :  { %1097 = vmatprep.subr.bf16.mxu0 %v1096_v23 }
 0x8a8   :  { %1098 = vmatpush1.bf16.msra.mxu0 %v1095_v36 }
 0x8a9   :  { %1453 = vmatprep.subr.bf16.mxu0 %v1566_v24 }
 0x8ab   :  { %1410 = vmatmul.mubr.msk.bf16.vlgmr.msra.gmra.mrb[8].mxu0 %vm152_vm1, %v1924_v12  ;;  %v1578_v12 = vld [vmem:[#allocation11 + $0x70] sm:$0xff]  }
 0x8ac   :  { %1454 = vmatpush3.bf16.msra.mxu0 %v1567_v25 }
 0x8ad   :  { %1455 = vmatprep.subr.bf16.mxu0 %v1568_v26 }
 0x8b0   :  { %1456 = vmatpush3.bf16.msra.mxu0 %v1569_v31 }
 0x8b1   :  { %1457 = vmatprep.subr.bf16.mxu0 %v1570_v27 }
 0x8b4   :  { %1458 = vmatpush3.bf16.msra.mxu0 %v1571_v28 }
 0x8b5   :  { %1459 = vmatprep.subr.bf16.mxu0 %v1572_v29 }
 0x8b8   :  { %1460 = vmatpush3.bf16.msra.mxu0 %v1573_v30 }
 0x8b9   :  { %1461 = vmatprep.subr.bf16.mxu0 %v1574_v33  ;;  %v1326_v33 = vrot.slane %v1094_v50, %v1967_v62 }
 0x8bc   :  { %1462 = vmatpush3.bf16.msra.mxu0 %v1575_v38 }
 0x8bd   :  { %1463 = vmatprep.subr.bf16.mxu0 %v1576_v39  ;;  %v1332_v39 = vrot.slane %v1094_v50, %v1971_v1 }
 0x8c0   :  { %1464 = vmatpush3.bf16.msra.mxu0 %v1577_v40 }
 0x8c1   :  { %1465 = vmatprep.subr.bf16.mxu0 %v1578_v12 }
 0x8c4   :  { %1466 = vmatpush3.bf16.msra.mxu0 %v1579_v41 }
 0x8c5   :  { %1467 = vmatprep.subr.bf16.mxu0 %v1580_v42 }
 0x8c8   :  { %1468 = vmatpush3.bf16.msra.mxu0 %v1581_v43 }
 0x97e   :  { %v1131_v44 = vpop.f32.mrb[8].mxu0 }
 0x97f   :  { %v1133_v45 = vpop.f32.mrb[9].mxu0 }
 0x980   :  { %v1135_v46 = vpop.f32.mrb[10].mxu0 }
 0x981   :  { %v1140_v47 = vpack.c.bf16 %v1135_v46, %v1131_v44  ;;  %v1137_v48 = vpop.f32.mrb[11].mxu0 }
 0x982   :  { %v1141_v49 = vpack.c.bf16 %v1137_v48, %v1133_v45 }
 0x984   :  { %1274 = vmatprep.mubr.bf16.mxu0 %v1141_v49 }
 0x985   :  { %1275 = vmatmul.mubr.bf16.vlgmr.msra.gmra.mrb[12].mxu0 %v1140_v47 }
 0xa58   :  { %v1469_v37 = vpop.f32.mrb[12].mxu0 }
 0xa59   :  { %v1470_v52 = vpop.f32.mrb[13].mxu0 }
 0xa5a   :  { %v1471_v53 = vadd.f32 %v1470_v52, %v1469_v37  ;;  %v1472_v54 = vpop.f32.mrb[14].mxu0 }
 0xa5b   :  { %v1473_v55 = vpop.f32.mrb[15].mxu0 }
 0xa5c   :  { %v1277_v56 = vadd.f32 %v1471_v53, %v1145_v51  ;;  %v1474_v57 = vadd.f32 %v1473_v55, %v1472_v54 }
 0xa5e   :  { %v1280_v58 = vadd.f32 %v1474_v57, %v1145_v51  ;;  %v1283_v60 = vmul.f32 %v1277_v56, %v1277_v56 }
 0xa60   :  { %1285 = vadd.xlane.f32.xlu1 %v1283_v60  ;;  %v1284_v2 = vmul.f32 %v1280_v58, %v1280_v58 }
 0xa64   :  { %1287 = vadd.xlane.f32.xlu1 %v1284_v2 }
 0xaed   :  { %v1286_v3 = vpop.xlane.xlu1 %1285 }
 0xaee   :  { %v1289_v5 = vmax.f32 %v1286_v3, 1e-24 }
 0xaf0   :  { %1604 = vrsqrt.f32 %v1289_v5 }
 0xaf1   :  { %v1288_v6 = vpop.xlane.xlu1 %1287 }
 0xaf2   :  { %v1290_v8 = vmax.f32 %v1288_v6, 1e-24 }
 0xaf4   :  { %1606 = vrsqrt.f32 %v1290_v8 }
 0xafa   :  { %v1605_v9 = vpop.eup %1604 }
 0xafb   :  { %v1293_v10 = vmul.f32 %v1605_v9, %v1277_v56 }
 0xafd   :  { %v1295_v59 = vmul.f32 %v1293_v10, %v1909_v4 }
 0xafe   :  { %v1607_v35 = vpop.eup %1606 }
 0xaff   :  { %v1294_v61 = vmul.f32 %v1607_v35, %v1280_v58 }
 0xb01   :  { %v1296_v11 = vmul.f32 %v1294_v61, %v1917_v7 }
 0xb03   :  { %v1297_v13 = vadd.f32 %v1296_v11, %v1295_v59 }
 0xb05   :  { %v1298_v34 = vrot.slane %v1297_v13, 4 }
 0xb07   :  { %v1299_v14 = vadd.f32 %v1298_v34, %v1297_v13 }
 0xb09   :  { %v1300_v63 = vrot.slane %v1299_v14, 2 }
 0xb0b   :  { %v1301_v15 = vadd.f32 %v1300_v63, %v1299_v14 }
 0xb0d   :  { %v1302_v16 = vrot.slane %v1301_v15, 1 }
 0xb0f   :  { %v1303_v32 = vadd.f32 %v1302_v16, %v1301_v15 }
 0xb11   :  { %v1304_v17 = vmul.f32 %v1303_v32, %v1955_v22 }
 0xb13   :  { %v1306_v18 = vsub.f32 %v1294_v61, %v1304_v17  ;;  %v1305_v19 = vsub.f32 %v1293_v10, %v1304_v17 }
 0xb15   :  { %v1308_v20 = vmul.f32 %v1306_v18, %v1917_v7  ;;  %v1307_v0 = vmul.f32 %v1305_v19, %v1909_v4 }
 0xb17   :  { %v1310_v21 = vmul.f32 %v1308_v20, %v1308_v20  ;;  %v1309_v23 = vmul.f32 %v1307_v0, %v1307_v0 }
 0xb19   :  { %v1311_v24 = vadd.f32 %v1310_v21, %v1309_v23 }
 0xb1b   :  { %v1312_v36 = vrot.slane %v1311_v24, 4 }
 0xb1d   :  { %v1313_v25 = vadd.f32 %v1312_v36, %v1311_v24 }
 0xb1f   :  { %v1314_v26 = vrot.slane %v1313_v25, 2 }
 0xb21   :  { %v1315_v31 = vadd.f32 %v1314_v26, %v1313_v25 }
 0xb23   :  { %v1316_v27 = vrot.slane %v1315_v31, 1 }
 0xb25   :  { %v1317_v28 = vadd.f32 %v1316_v27, %v1315_v31 }
 0xb27   :  { %v1318_v29 = vmul.f32 %v1317_v28, %v1955_v22 }
 0xb29   :  { %v1319_v30 = vadd.f32 1e-05, %v1318_v29 }
 0xb2b   :  { %1608 = vrsqrt.f32 %v1319_v30 }
 0xb35   :  { %v1609_v38 = vpop.eup %1608 }
 0xb36   :  { %v1321_v40 = vmul.f32 %v1609_v38, %v1305_v19  ;;  %v1322_v12 = vmul.f32 %v1609_v38, %v1306_v18 }
 0xb38   :  { %v1327_v41 = vmul.f32 %v1326_v33, %v1321_v40  ;;  %v1328_v42 = vmul.f32 %v1326_v33, %v1322_v12 }
 0xb3a   :  { %v1333_v43 = vadd.f32 %v1332_v39, %v1327_v41  ;;  %v1334_v44 = vadd.f32 %v1332_v39, %v1328_v42 }
 0xb3c   :  { %v1335_v45 = vmul.f32 %v1333_v43, %v1909_v4  ;;  %v1336_v46 = vmul.f32 %v1334_v44, %v1917_v7 }
 0xb3e   :  { %1337 = vst [vmem:[#allocation12] sm:$0xff] %v1335_v45  ;;  %1338 = vst [vmem:[#allocation12 + $0x8] sm:$0xff] %v1336_v46 }
 0xb3f   :  { %1731 = shalt.err (!%p1728_p2)
}
 0xb40   :  { %s1732_s15 = scalar_lea.hbm %s2093_s12, 256 }
 0xb41   :  { %p1733_p3 = scmp.ne.s32.totalorder %s2093_s12, %s1732_s15  ;;  %p1736_p4 = scmp.lt.u32.totalorder %s1732_s15, %s2093_s12 }
 0xb43   :  { %p1738_p5 = pnand %p1736_p4, %p1733_p3 }
 0xb45   :  { %1741 = shalt.err (!%p1738_p5)
}
 0xb46   :  { %1350 = dma.vmem_to_hbm [thread:$0]  %s1345_s8, 256, %s2093_s12, [#allocation5], %s1755_s22, %s1755_s22, %s1756_s29  }
 0xb47   :  { %1748 = dma.done.wait [#allocation5], 256  }
 0xb48   :  { %1749 = vsyncadd [#allocation5], 4294967040 }
 0xb49   :  { %1354 = vsyncpa [#allocation4], 1 }
 0xb4a   :  { %1355 = vsyncpa [#allocation7], 1 }
 0xb4b   :  { %1356 = vsyncpa [#allocation10], 1 }
 0xb4c   :  { %1357 = vsyncpa [#allocation5], 1 }

</bundles_post_ra>
